<compile_context>
chip_gen: v7x
topology: tpu7x:2x2x1
jax: 0.10.0
libtpu: 0.0.40
codegen_flags: <defaults>
</compile_context>

<pallas_src>
import jax
import jax.numpy as jnp
from jax import lax
from jax.experimental import pallas as pl
from jax.experimental.pallas import tpu as pltpu


# ----------------------------- VMEM budgeting -------------------------------

def _vmem_budget_bytes() -> int:
    """Chip-aware usable-VMEM estimate (~75% of physical capacity per core)."""
    try:
        cap = pltpu.get_tpu_info().vmem_capacity_bytes
    except Exception:
        cap = 64 * 1024 * 1024  # conservative fallback: v7x per-TC VMEM
    return int(cap) * 3 // 4


def _vmem_need_bytes(g, tn, tk, batch, w_item, x_item, o_item) -> int:
    """Per-step VMEM footprint estimate for a candidate tiling."""
    wblk = 2 * g * tn * tk * w_item    # double-buffered weight block
    xblk = 2 * batch * tk * x_item     # double-buffered x block
    oblk = 2 * batch * tn * o_item     # double-buffered output block
    bblk = 2 * tn * 4                  # mean-bias block (f32)
    acc = batch * tn * 4               # (B, TN) f32 accumulator scratch
    wsum = 2 * tn * tk * 4             # live f32 slabs during the member sum
    return wblk + xblk + oblk + bblk + acc + wsum


# ------------------------------- tile pickers --------------------------------

def _pick_out_tile(d_out: int) -> int:
    """Lane-dense output tile; keep >=2 tiles so the 'parallel' axis feeds both
    TensorCores on v7x whenever D_out allows."""
    if d_out % 128 != 0:
        # TODO(synk): non-128-multiple D_out lowers to masked vst; pad upstream if hot.
        return d_out
    best = d_out
    for t in (512, 256, 128):
        if d_out % t == 0:
            if d_out // t >= 2:
                return t
            best = t
    return best


def _pick_k_tile(d_in, tn, batch, w_item, x_item, o_item, budget) -> int:
    """Full D_in if it fits the budget at g=1, else the largest lane-aligned
    divisor that does."""
    def fits(tk):
        return _vmem_need_bytes(1, tn, tk, batch, w_item, x_item, o_item) <= budget
    if fits(d_in):
        return d_in
    cands = [c for c in range(128, d_in, 128) if d_in % c == 0]
    for tk in sorted(cands, reverse=True):
        if fits(tk):
            return tk
    return d_in  # cannot tile cleanly; fall back to the whole reduction dim


def _pick_member_block(m, tn, tk, batch, w_item, x_item, o_item, budget) -> int:
    """Largest divisor of M whose double-buffered weight block (+ everything
    else resident) fits the VMEM budget."""
    g = m
    while g > 1:
        if m % g == 0 and _vmem_need_bytes(g, tn, tk, batch,
                                           w_item, x_item, o_item) <= budget:
            return g
        g -= 1
    return 1


# --------------------------------- kernel ------------------------------------

def ensemble_forward(x, weights, biases, *, out_tile=None, member_block=None,
                     k_tile=None):
    """Average of M linear ensemble members.

    x:       (B, D_in)
    weights: (M, D_out, D_in)  -- PyTorch nn.Linear convention, consumed as-is
    biases:  (M, D_out)
    returns  (B, D_out) = mean_m( x @ W_m^T + b_m )
    """
    M, D_out, D_in = weights.shape
    B = x.shape[0]

    budget = _vmem_budget_bytes()
    w_item = weights.dtype.itemsize
    x_item = x.dtype.itemsize
    o_item = x.dtype.itemsize

    tn = out_tile if out_tile is not None else _pick_out_tile(D_out)
    tk = k_tile if k_tile is not None else _pick_k_tile(
        D_in, tn, B, w_item, x_item, o_item, budget)
    g = member_block if member_block is not None else _pick_member_block(
        M, tn, tk, B, w_item, x_item, o_item, budget)
    assert D_out % tn == 0, "output tile must divide D_out"
    assert D_in % tk == 0, "K tile must divide D_in"
    assert M % g == 0, "member block must divide M"

    n_out = D_out // tn   # leading "parallel" axis (megacore sharding on v7x)
    n_mem = M // g        # member-reduction axis
    n_k = D_in // tk      # K-reduction axis
    inv_m = 1.0 / M
    # Feed the MXU at x's native rate (bf16 LHS stays bf16); f32 acc either way.
    rhs_dtype = jnp.float32 if x.dtype == jnp.float32 else x.dtype

    # Bias hoisted out of the member loop: tiny XLA reduce in the wrapper,
    # added once in the kernel's finalize branch.
    b_mean = jnp.mean(biases.astype(jnp.float32), axis=0, keepdims=True)  # (1, D_out)

    def kernel(x_ref, w_ref, bm_ref, o_ref, acc_ref):
        m = pl.program_id(1)
        k = pl.program_id(2)

        @pl.when(jnp.logical_and(m == 0, k == 0))
        def _():
            acc_ref[...] = jnp.zeros_like(acc_ref)

        # Sum this step's G member weight slabs one at a time (live set stays
        # ~2 slabs; VPU adds hide under the weight DMA).
        w_sum = lax.fori_loop(
            1, g,
            lambda i, ws: ws + w_ref[i].astype(jnp.float32),
            w_ref[0].astype(jnp.float32),
            unroll=True,
        )  # (TN, TK) f32

        # One small "NT" matmul per grid step into the (B, TN) accumulator:
        # contract TK of x against TK of the freshly summed weights.
        acc_ref[...] += lax.dot_general(
            x_ref[...],
            w_sum.astype(rhs_dtype),
            dimension_numbers=(((1,), (1,)), ((), ())),
            preferred_element_type=jnp.float32,
        )

        @pl.when(jnp.logical_and(m == pl.num_programs(1) - 1,
                                 k == pl.num_programs(2) - 1))
        def _():
            o_ref[...] = (acc_ref[...] * inv_m + bm_ref[...]).astype(o_ref.dtype)

    cost = pl.CostEstimate(
        flops=2 * B * D_in * D_out,
        transcendentals=0,
        bytes_accessed=int(weights.nbytes + biases.nbytes + x.nbytes
                           + B * D_out * x.dtype.itemsize),
    )

    return pl.pallas_call(
        kernel,
        out_shape=jax.ShapeDtypeStruct((B, D_out), x.dtype),
        grid=(n_out, n_mem, n_k),
        in_specs=[
            pl.BlockSpec((B, tk), lambda j, m, k: (0, k)),         # x slab
            pl.BlockSpec((g, tn, tk), lambda j, m, k: (m, j, k)),  # G member weights
            pl.BlockSpec((1, tn), lambda j, m, k: (0, j)),         # mean bias tile
        ],
        out_specs=pl.BlockSpec((B, tn), lambda j, m, k: (0, j)),
        scratch_shapes=[pltpu.VMEM((B, tn), jnp.float32)],         # output-space acc
        compiler_params=pltpu.CompilerParams(
            dimension_semantics=("parallel", "arbitrary", "arbitrary"),
            vmem_limit_bytes=budget,
        ),
        cost_estimate=cost,
    )(x, weights, b_mean)


def _reference(x, weights, biases):
    """Pure-JAX reference: mean of per-member linear outputs."""
    return jnp.mean(
        jnp.einsum("bi,moi->mbo", x, weights) + biases[:, None, :], axis=0
    )


if __name__ == "__main__":
    key = jax.random.PRNGKey(0)

    # Case 1: 4 members of Linear(128 -> 128), batch 8 (collapses to one fat
    # grid step: single member block, single output tile, single K tile).
    M, B, D_in, D_out = 4, 8, 128, 128
    k1, k2, k3, key = jax.random.split(key, 4)
    bound = 1.0 / (D_in ** 0.5)
    x = jax.random.normal(k1, (B, D_in), dtype=jnp.float32)
    w = jax.random.uniform(k2, (M, D_out, D_in), jnp.float32, -bound, bound)
    b = jax.random.uniform(k3, (M, D_out), jnp.float32, -bound, bound)

    out = jax.block_until_ready(ensemble_forward(x, w, b))
    ref = _reference(x, w, b)
    assert out.shape == (B, D_out)
    assert jnp.allclose(out, ref, atol=1e-4, rtol=1e-5), (
        f"max err {float(jnp.max(jnp.abs(out - ref)))}"
    )

    # Case 2: exercise the multi-tile / multi-step path:
    # 3 parallel output tiles x 3 member steps (2 members each) x 2 K tiles.
    M2, B2, D_in2, D_out2 = 6, 8, 256, 384
    k1, k2, k3, key = jax.random.split(key, 4)
    bound2 = 1.0 / (D_in2 ** 0.5)
    x2 = jax.random.normal(k1, (B2, D_in2), dtype=jnp.float32)
    w2 = jax.random.uniform(k2, (M2, D_out2, D_in2), jnp.float32, -bound2, bound2)
    b2 = jax.random.uniform(k3, (M2, D_out2), jnp.float32, -bound2, bound2)

    out2 = jax.block_until_ready(
        ensemble_forward(x2, w2, b2, member_block=2, k_tile=128))
    ref2 = _reference(x2, w2, b2)
    assert out2.shape == (B2, D_out2)
    assert jnp.allclose(out2, ref2, atol=1e-4, rtol=1e-5), (
        f"max err {float(jnp.max(jnp.abs(out2 - ref2)))}"
    )

    print("KERNEL_OK")
</pallas_src>

<mosaic_0001>
module attributes {stable_mosaic.version = 11 : i64} {
  func.func @kernel(%arg0: i32, %arg1: i32, %arg2: i32, %arg3: memref<8x128xf32, #tpu.memory_space<vmem>>, %arg4: memref<4x128x128xf32, #tpu.memory_space<vmem>>, %arg5: memref<1x128xf32, #tpu.memory_space<vmem>>, %arg6: memref<8x128xf32, #tpu.memory_space<vmem>>, %arg7: memref<8x128xf32, #tpu.memory_space<vmem>>) attributes {dimension_semantics = [#tpu.dimension_semantics<parallel>, #tpu.dimension_semantics<arbitrary>, #tpu.dimension_semantics<arbitrary>], iteration_bounds = array<i64: 1, 1, 1>, scalar_prefetch = 0 : i64, scratch_operands = 1 : i64, tpu.core_type = #tpu.core_type<tc>, window_params = [{transform_indices = @transform_0, window_bounds = array<i64: 8, 128>}, {transform_indices = @transform_1, window_bounds = array<i64: 4, 128, 128>}, {transform_indices = @transform_2, window_bounds = array<i64: 1, 128>}, {transform_indices = @transform_3, window_bounds = array<i64: 8, 128>}]} {
    %c0_i32 = arith.constant 0 : i32
    %0 = arith.cmpi eq, %arg1, %c0_i32 : i32
    %c0_i32_0 = arith.constant 0 : i32
    %1 = arith.cmpi eq, %arg2, %c0_i32_0 : i32
    %2 = arith.andi %0, %1 : i1
    %3 = arith.extui %2 : i1 to i32
    %c0_i32_1 = arith.constant 0 : i32
    %4 = arith.cmpi ne, %3, %c0_i32_1 : i32
    scf.if %4 {
      %cst_20 = arith.constant 0.000000e+00 : f32
      %29 = vector.broadcast %cst_20 : f32 to vector<8x128xf32>
      %c0_21 = arith.constant 0 : index
      %c0_22 = arith.constant 0 : index
      %30 = vector.load %arg7[%c0_21, %c0_22] : memref<8x128xf32, #tpu.memory_space<vmem>>, vector<8x128xf32>
      tpu.vector_store %arg7[%c0_21, %c0_22], %29 {strides = array<i32>} : memref<8x128xf32, #tpu.memory_space<vmem>>, vector<8x128xf32>,
    } else {
    }
    %c0 = arith.constant 0 : index
    %c0_2 = arith.constant 0 : index
    %c0_3 = arith.constant 0 : index
    %5 = vector.load %arg4[%c0, %c0_2, %c0_3] : memref<4x128x128xf32, #tpu.memory_space<vmem>>, vector<1x128x128xf32>
    %6 = vector.shape_cast %5 : vector<1x128x128xf32> to vector<128x128xf32>
    %c1_i32 = arith.constant 1 : i32
    %7 = arith.index_cast %c1_i32 : i32 to index
    %c0_4 = arith.constant 0 : index
    %c0_5 = arith.constant 0 : index
    %8 = vector.load %arg4[%7, %c0_4, %c0_5] : memref<4x128x128xf32, #tpu.memory_space<vmem>>, vector<1x128x128xf32>
    %9 = vector.shape_cast %8 : vector<1x128x128xf32> to vector<128x128xf32>
    %10 = arith.addf %6, %9 : vector<128x128xf32>
    %c2_i32 = arith.constant 2 : i32
    %11 = arith.index_cast %c2_i32 : i32 to index
    %c0_6 = arith.constant 0 : index
    %c0_7 = arith.constant 0 : index
    %12 = vector.load %arg4[%11, %c0_6, %c0_7] : memref<4x128x128xf32, #tpu.memory_space<vmem>>, vector<1x128x128xf32>
    %13 = vector.shape_cast %12 : vector<1x128x128xf32> to vector<128x128xf32>
    %14 = arith.addf %10, %13 : vector<128x128xf32>
    %c3_i32 = arith.constant 3 : i32
    %15 = arith.index_cast %c3_i32 : i32 to index
    %c0_8 = arith.constant 0 : index
    %c0_9 = arith.constant 0 : index
    %16 = vector.load %arg4[%15, %c0_8, %c0_9] : memref<4x128x128xf32, #tpu.memory_space<vmem>>, vector<1x128x128xf32>
    %17 = vector.shape_cast %16 : vector<1x128x128xf32> to vector<128x128xf32>
    %18 = arith.addf %14, %17 : vector<128x128xf32>
    %c3_i32_10 = arith.constant 3 : i32
    %c0_11 = arith.constant 0 : index
    %c0_12 = arith.constant 0 : index
    %19 = vector.load %arg7[%c0_11, %c0_12] : memref<8x128xf32, #tpu.memory_space<vmem>>, vector<8x128xf32>
    %c0_13 = arith.constant 0 : index
    %c0_14 = arith.constant 0 : index
    %20 = vector.load %arg3[%c0_13, %c0_14] : memref<8x128xf32, #tpu.memory_space<vmem>>, vector<8x128xf32>
    %cst = arith.constant dense<0.000000e+00> : vector<8x128xf32>
    %21 = tpu.matmul %20, %18, %cst {dimension_numbers = #tpu.dot_dimension_numbers<[1], [1], [0], [0], [0, 0, 1, 0], [], []>} : vector<8x128xf32>, vector<128x128xf32>, vector<8x128xf32> -> vector<8x128xf32>
    %22 = arith.addf %19, %21 : vector<8x128xf32>
    %c0_15 = arith.constant 0 : index
    %c0_16 = arith.constant 0 : index
    %23 = vector.load %arg7[%c0_15, %c0_16] : memref<8x128xf32, #tpu.memory_space<vmem>>, vector<8x128xf32>
    tpu.vector_store %arg7[%c0_15, %c0_16], %22 {strides = array<i32>} : memref<8x128xf32, #tpu.memory_space<vmem>>, vector<8x128xf32>,
    %c0_i32_17 = arith.constant 0 : i32
    %24 = arith.cmpi eq, %arg1, %c0_i32_17 : i32
    %c0_i32_18 = arith.constant 0 : i32
    %25 = arith.cmpi eq, %arg2, %c0_i32_18 : i32
    %26 = arith.andi %24, %25 : i1
    %27 = arith.extui %26 : i1 to i32
    %c0_i32_19 = arith.constant 0 : i32
    %28 = arith.cmpi ne, %27, %c0_i32_19 : i32
    scf.if %28 {
      %c0_20 = arith.constant 0 : index
      %c0_21 = arith.constant 0 : index
      %29 = vector.load %arg7[%c0_20, %c0_21] : memref<8x128xf32, #tpu.memory_space<vmem>>, vector<8x128xf32>
      %cst_22 = arith.constant 2.500000e-01 : f32
      %30 = vector.broadcast %cst_22 : f32 to vector<8x128xf32>
      %31 = arith.mulf %29, %30 : vector<8x128xf32>
      %c0_23 = arith.constant 0 : index
      %c0_24 = arith.constant 0 : index
      %32 = vector.load %arg5[%c0_23, %c0_24] : memref<1x128xf32, #tpu.memory_space<vmem>>, vector<1x128xf32>
      %33 = vector.broadcast %32 : vector<1x128xf32> to vector<8x128xf32>
      %34 = arith.addf %31, %33 : vector<8x128xf32>
      %c0_25 = arith.constant 0 : index
      %c0_26 = arith.constant 0 : index
      %35 = vector.load %arg6[%c0_25, %c0_26] : memref<8x128xf32, #tpu.memory_space<vmem>>, vector<8x128xf32>
      tpu.vector_store %arg6[%c0_25, %c0_26], %34 {strides = array<i32>} : memref<8x128xf32, #tpu.memory_space<vmem>>, vector<8x128xf32>,
    } else {
    }
    return
  }
  func.func @transform_0(%arg0: i32, %arg1: i32, %arg2: i32) -> (i32, i32) {
    %c0_i32 = arith.constant 0 : i32
    %c0_i32_0 = arith.constant 0 : i32
    return %c0_i32, %arg2 : i32, i32
  }
  func.func @transform_1(%arg0: i32, %arg1: i32, %arg2: i32) -> (i32, i32, i32) {
    %c0_i32 = arith.constant 0 : i32
    return %arg1, %arg0, %arg2 : i32, i32, i32
  }
  func.func @transform_2(%arg0: i32, %arg1: i32, %arg2: i32) -> (i32, i32) {
    %c0_i32 = arith.constant 0 : i32
    %c0_i32_0 = arith.constant 0 : i32
    return %c0_i32, %arg0 : i32, i32
  }
  func.func @transform_3(%arg0: i32, %arg1: i32, %arg2: i32) -> (i32, i32) {
    %c0_i32 = arith.constant 0 : i32
    %c0_i32_0 = arith.constant 0 : i32
    return %c0_i32, %arg0 : i32, i32
  }
}

</mosaic_0001>

<bundles_post_ra>
// kernel: tpu_custom_call.1
= control target key start
LH: loop header
LB: loop body
LE: loop exit
PB: predicated region body
PF: predicated region fallthrough
CT: control target
= control target key end

     0   :  { %8 = vsyncpa [#allocation4], 0  ;;  %s505_s0 = inlined_call_operand.hbm [shape: f32[8,128], index: 0, kind: input, shape index: {}]   ;;  %s506_s1 = inlined_call_operand.hbm [shape: f32[4,128,128], index: 1, kind: input, shape index: {}]   ;;  %s507_s2 = inlined_call_operand.vmem [shape: f32[1,128], index: 2, kind: input, shape index: {}]   ;;  %s508_s3 = inlined_call_operand.hbm [shape: f32[8,128], index: 3, kind: output, shape index: {}]  }
   0x1   :  { %9 = vsyncpa [#allocation7], 0 }
   0x2   :  { %10 = vsyncpa [#allocation5], 0  ;;  %s423_s12 = smov [#allocation3]   ;;  %s424_s14 = smov [#allocation6]  }
   0x3   :  { %s17_s13 = sshll.u32 %s423_s12, 4  ;;  %s26_s15 = sshll.u32 %s424_s14, 4  ;;  %s18_s13 = int_to_ptr.vmem [resolvable:$true] %s17_s13  ;;  %s451_s15 = int_to_ptr.vmem [resolvable:$true] %s26_s15 }
   0x4   :  { %s351_s18 = scalar_lea.hbm %s505_s0, 128 }
   0x5   :  { %p352_p0 = scmp.ne.s32.totalorder %s505_s0, %s351_s18  ;;  %p355_p1 = scmp.lt.u32.totalorder %s351_s18, %s505_s0 }
   0x7   :  { %p357_p2 = pnand %p355_p1, %p352_p0 }
   0x9   :  { %360 = shalt.err (!%p357_p2)
}
   0xa   :  { %s361_s23 = scalar_lea.vmem %s18_s13, 128  ;;  %p366_p4 = scmp.lt.s32.totalorder %s18_s13, %s18_s13 }
   0xb   :  { %p362_p3 = scmp.ne.s32.totalorder %s18_s13, %s361_s23  ;;  %p367_p5 = scmp.lt.s32.totalorder %s361_s23, %s361_s23 }
   0xd   :  { %p368_p6 = por %p367_p5, %p366_p4 }
   0xf   :  { %p369_p7 = pnand %p368_p6, %p362_p3 }
  0x11   :  { %372 = shalt.err (!%p369_p7)
}
  0x12   :  { %20 = dma.hbm_to_vmem [thread:$0]  %s505_s0, 128, %s18_s13, [#allocation4]  }
  0x13   :  { %s373_s28 = scalar_lea.hbm %s506_s1, 8192 }
  0x14   :  { %p374_p8 = scmp.ne.s32.totalorder %s506_s1, %s373_s28  ;;  %p377_p9 = scmp.lt.u32.totalorder %s373_s28, %s506_s1 }
  0x16   :  { %p379_p10 = pnand %p377_p9, %p374_p8 }
  0x18   :  { %382 = shalt.err (!%p379_p10)
}
  0x19   :  { %s383_s6 = scalar_lea.vmem %s451_s15, 8192  ;;  %p388_p12 = scmp.lt.s32.totalorder %s451_s15, %s451_s15 }
  0x1a   :  { %p384_p11 = scmp.ne.s32.totalorder %s451_s15, %s383_s6  ;;  %p389_p13 = scmp.lt.s32.totalorder %s383_s6, %s383_s6 }
  0x1c   :  { %p390_p0 = por %p389_p13, %p388_p12 }
  0x1e   :  { %p391_p1 = pnand %p390_p0, %p384_p11 }
  0x20   :  { %394 = shalt.err (!%p391_p1)
}
  0x21   :  { %s425_s0 = smov 128   ;;  %s426_s7 = smov 8  }
  0x22   :  { %32 = dma.hbm_to_vmem [thread:$0]  %s506_s1, 8192, %s451_s15, [#allocation7], %s425_s0, %s425_s0, %s426_s7  }
  0x23   :  { %417 = dma.done.wait [#allocation4], 128  }
  0x24   :  { %418 = vsyncadd [#allocation4], 4294967168 }
  0x25   :  { %419 = dma.done.wait [#allocation7], 8192  }
  0x26   :  { %420 = vsyncadd [#allocation7], 4294959104  ;;  %v427_v0 = vmov 0.0|0.0   ;;  %vm428_vm0 = vmmov 0   ;;  %v429_v1 = vmov 0.0   ;;  %v48_v2 = vld [vmem:[#allocation6] sm:$0xff] }
  0x27   :  { %319 = vmatprep.subr.bf16.mxu0 %v427_v0  ;;  %316 = vmatprep.mubr.msk.f32.mxu0 %vm428_vm0, %v429_v1  ;;  %v49_v3 = vld [vmem:[#allocation6 + $0x8] sm:$0xff]  ;;  %v65_v4 = vld [vmem:[#allocation6 + $0x80] sm:$0xff]  ;;  %v50_v12 = vld [vmem:[#allocation6 + $0x10] sm:$0xff]  ;;  %s430_s11 = smov [#allocation8]  }
  0x28   :  { %v66_v5 = vld [vmem:[#allocation6 + $0x88] sm:$0xff]  ;;  %v81_v6 = vadd.f32 %v65_v4, %v48_v2  ;;  %v98_v7 = vld [vmem:[#allocation6 + $0x100] sm:$0xff]  ;;  %v51_v14 = vld [vmem:[#allocation6 + $0x18] sm:$0xff]  ;;  %s256_s12 = sshll.u32 %s430_s11, 4  ;;  %s257_s12 = int_to_ptr.vmem [resolvable:$true] %s256_s12 }
  0x29   :  { %v99_v8 = vld [vmem:[#allocation6 + $0x108] sm:$0xff]  ;;  %v82_v9 = vadd.f32 %v66_v5, %v49_v3  ;;  %v131_v10 = vld [vmem:[#allocation6 + $0x180] sm:$0xff]  ;;  %v67_v15 = vld [vmem:[#allocation6 + $0x90] sm:$0xff]  ;;  %s395_s13 = scalar_lea.vmem %s257_s12, 128  ;;  %p400_p3 = scmp.lt.s32.totalorder %s257_s12, %s257_s12 }
  0x2a   :  { %v132_v11 = vld [vmem:[#allocation6 + $0x188] sm:$0xff]  ;;  %v114_v13 = vadd.f32 %v98_v7, %v81_v6  ;;  %v68_v16 = vld [vmem:[#allocation6 + $0x98] sm:$0xff]  ;;  %v83_v18 = vadd.f32 %v67_v15, %v50_v12  ;;  %v100_v20 = vld [vmem:[#allocation6 + $0x110] sm:$0xff]  ;;  %p396_p2 = scmp.ne.s32.totalorder %s257_s12, %s395_s13  ;;  %p401_p4 = scmp.lt.s32.totalorder %s395_s13, %s395_s13 }
  0x2b   :  { %v115_v17 = vadd.f32 %v99_v8, %v82_v9  ;;  %v84_v19 = vadd.f32 %v68_v16, %v51_v14  ;;  %v101_v21 = vld [vmem:[#allocation6 + $0x118] sm:$0xff]  ;;  %v133_v26 = vld [vmem:[#allocation6 + $0x190] sm:$0xff]  ;;  %v52_v28 = vld [vmem:[#allocation6 + $0x20] sm:$0xff] }
  0x2c   :  { %v147_v22 = vadd.f32 %v131_v10, %v114_v13  ;;  %v116_v24 = vadd.f32 %v100_v20, %v83_v18  ;;  %v134_v27 = vld [vmem:[#allocation6 + $0x198] sm:$0xff]  ;;  %v53_v29 = vld [vmem:[#allocation6 + $0x28] sm:$0xff]  ;;  %v69_v30 = vld [vmem:[#allocation6 + $0xa0] sm:$0xff]  ;;  %p402_p5 = por %p401_p4, %p400_p3 }
  0x2d   :  { %v148_v23 = vadd.f32 %v132_v11, %v115_v17  ;;  %v117_v25 = vadd.f32 %v101_v21, %v84_v19  ;;  %v70_v31 = vld [vmem:[#allocation6 + $0xa8] sm:$0xff]  ;;  %v85_v35 = vadd.f32 %v69_v30, %v52_v28  ;;  %v102_v37 = vld [vmem:[#allocation6 + $0x120] sm:$0xff]  ;;  %v54_v44 = vld [vmem:[#allocation6 + $0x30] sm:$0xff] }
  0x2e   :  { %v149_v33 = vadd.f32 %v133_v26, %v116_v24  ;;  %v86_v36 = vadd.f32 %v70_v31, %v53_v29  ;;  %v103_v38 = vld [vmem:[#allocation6 + $0x128] sm:$0xff]  ;;  %v135_v42 = vld [vmem:[#allocation6 + $0x1a0] sm:$0xff]  ;;  %v55_v45 = vld [vmem:[#allocation6 + $0x38] sm:$0xff]  ;;  %p403_p6 = pnand %p402_p5, %p396_p2 }
  0x2f   :  { %v320_v32 = vpack.c.bf16 %v148_v23, %v147_v22  ;;  %v150_v34 = vadd.f32 %v134_v27, %v117_v25  ;;  %v118_v40 = vadd.f32 %v102_v37, %v85_v35  ;;  %v136_v43 = vld [vmem:[#allocation6 + $0x1a8] sm:$0xff]  ;;  %v71_v46 = vld [vmem:[#allocation6 + $0xb0] sm:$0xff]  ;;  %v72_v47 = vld [vmem:[#allocation6 + $0xb8] sm:$0xff] }
  0x30   :  { %v119_v41 = vadd.f32 %v103_v38, %v86_v36  ;;  %v87_v50 = vadd.f32 %v71_v46, %v54_v44  ;;  %v88_v51 = vadd.f32 %v72_v47, %v55_v45  ;;  %v104_v52 = vld [vmem:[#allocation6 + $0x130] sm:$0xff]  ;;  %v105_v53 = vld [vmem:[#allocation6 + $0x138] sm:$0xff]  ;;  %v56_v59 = vld [vmem:[#allocation6 + $0x40] sm:$0xff] }
  0x31   :  { %321 = vmatpush3.bf16.xpose.msra.mxu0 %v320_v32  ;;  %v323_v39 = vpack.c.bf16 %v150_v34, %v149_v33  ;;  %v151_v48 = vadd.f32 %v135_v42, %v118_v40  ;;  %v137_v57 = vld [vmem:[#allocation6 + $0x1b0] sm:$0xff]  ;;  %v138_v58 = vld [vmem:[#allocation6 + $0x1b8] sm:$0xff]  ;;  %v57_v60 = vld [vmem:[#allocation6 + $0x48] sm:$0xff] }
  0x32   :  { %322 = vmatprep.subr.bf16.mxu0 %v427_v0  ;;  %v152_v49 = vadd.f32 %v136_v43, %v119_v41  ;;  %v120_v55 = vadd.f32 %v104_v52, %v87_v50  ;;  %v121_v56 = vadd.f32 %v105_v53, %v88_v51  ;;  %v73_v61 = vld [vmem:[#allocation6 + $0xc0] sm:$0xff]  ;;  %v74_v62 = vld [vmem:[#allocation6 + $0xc8] sm:$0xff]  ;;  %v58_v11 = vld [vmem:[#allocation6 + $0x50] sm:$0xff] }
  0x33   :  { %v89_v2 = vadd.f32 %v73_v61, %v56_v59  ;;  %v90_v3 = vadd.f32 %v74_v62, %v57_v60  ;;  %v106_v4 = vld [vmem:[#allocation6 + $0x140] sm:$0xff]  ;;  %v107_v5 = vld [vmem:[#allocation6 + $0x148] sm:$0xff]  ;;  %v59_v12 = vld [vmem:[#allocation6 + $0x58] sm:$0xff] }
  0x34   :  { %v326_v54 = vpack.c.bf16 %v152_v49, %v151_v48  ;;  %v153_v63 = vadd.f32 %v137_v57, %v120_v55  ;;  %v154_v1 = vadd.f32 %v138_v58, %v121_v56  ;;  %v139_v9 = vld [vmem:[#allocation6 + $0x1c0] sm:$0xff]  ;;  %v140_v10 = vld [vmem:[#allocation6 + $0x1c8] sm:$0xff]  ;;  %v75_v13 = vld [vmem:[#allocation6 + $0xd0] sm:$0xff] }
  0x35   :  { %v122_v7 = vadd.f32 %v106_v4, %v89_v2  ;;  %v123_v8 = vadd.f32 %v107_v5, %v90_v3  ;;  %v76_v14 = vld [vmem:[#allocation6 + $0xd8] sm:$0xff]  ;;  %v91_v17 = vadd.f32 %v75_v13, %v58_v11  ;;  %v108_v19 = vld [vmem:[#allocation6 + $0x150] sm:$0xff]  ;;  %v60_v26 = vld [vmem:[#allocation6 + $0x60] sm:$0xff] }
  0x36   :  { %v329_v6 = vpack.c.bf16 %v154_v1, %v153_v63  ;;  %v92_v18 = vadd.f32 %v76_v14, %v59_v12  ;;  %v109_v20 = vld [vmem:[#allocation6 + $0x158] sm:$0xff]  ;;  %v141_v24 = vld [vmem:[#allocation6 + $0x1d0] sm:$0xff]  ;;  %v61_v27 = vld [vmem:[#allocation6 + $0x68] sm:$0xff] }
  0x37   :  { %v155_v15 = vadd.f32 %v139_v9, %v122_v7  ;;  %v156_v16 = vadd.f32 %v140_v10, %v123_v8  ;;  %v124_v22 = vadd.f32 %v108_v19, %v91_v17  ;;  %v142_v25 = vld [vmem:[#allocation6 + $0x1d8] sm:$0xff]  ;;  %v77_v28 = vld [vmem:[#allocation6 + $0xe0] sm:$0xff]  ;;  %v78_v29 = vld [vmem:[#allocation6 + $0xe8] sm:$0xff] }
  0x38   :  { %v125_v23 = vadd.f32 %v109_v20, %v92_v18  ;;  %v93_v32 = vadd.f32 %v77_v28, %v60_v26  ;;  %v94_v33 = vadd.f32 %v78_v29, %v61_v27  ;;  %v110_v34 = vld [vmem:[#allocation6 + $0x160] sm:$0xff]  ;;  %v111_v35 = vld [vmem:[#allocation6 + $0x168] sm:$0xff]  ;;  %v62_v41 = vld [vmem:[#allocation6 + $0x70] sm:$0xff] }
  0x39   :  { %324 = vmatpush3.bf16.xpose.msra.mxu0 %v323_v39  ;;  %v332_v21 = vpack.c.bf16 %v156_v16, %v155_v15  ;;  %v157_v30 = vadd.f32 %v141_v24, %v124_v22  ;;  %v143_v39 = vld [vmem:[#allocation6 + $0x1e0] sm:$0xff]  ;;  %v144_v40 = vld [vmem:[#allocation6 + $0x1e8] sm:$0xff]  ;;  %v63_v42 = vld [vmem:[#allocation6 + $0x78] sm:$0xff] }
  0x3a   :  { %325 = vmatprep.subr.bf16.mxu0 %v427_v0  ;;  %v158_v31 = vadd.f32 %v142_v25, %v125_v23  ;;  %v126_v37 = vadd.f32 %v110_v34, %v93_v32  ;;  %v127_v38 = vadd.f32 %v111_v35, %v94_v33  ;;  %v79_v43 = vld [vmem:[#allocation6 + $0xf0] sm:$0xff]  ;;  %v80_v44 = vld [vmem:[#allocation6 + $0xf8] sm:$0xff] }
  0x3b   :  { %v95_v47 = vadd.f32 %v79_v43, %v62_v41  ;;  %v96_v48 = vadd.f32 %v80_v44, %v63_v42  ;;  %v112_v49 = vld [vmem:[#allocation6 + $0x170] sm:$0xff]  ;;  %v113_v50 = vld [vmem:[#allocation6 + $0x178] sm:$0xff] }
  0x3c   :  { %v335_v36 = vpack.c.bf16 %v158_v31, %v157_v30  ;;  %v159_v45 = vadd.f32 %v143_v39, %v126_v37  ;;  %v160_v46 = vadd.f32 %v144_v40, %v127_v38  ;;  %v146_v55 = vld [vmem:[#allocation6 + $0x1f8] sm:$0xff] }
  0x3d   :  { %v128_v52 = vadd.f32 %v112_v49, %v95_v47  ;;  %v129_v53 = vadd.f32 %v113_v50, %v96_v48  ;;  %v164_v59 = vld [vmem:[#allocation3] sm:$0xff] }
  0x3e   :  { %v338_v51 = vpack.c.bf16 %v160_v46, %v159_v45  ;;  %v266_v61 = vld [vmem:[%s507_s2] ss:$0 sm:$0xff] }
  0x3f   :  { %v162_v57 = vadd.f32 %v146_v55, %v129_v53 }
  0x41   :  { %327 = vmatpush3.bf16.xpose.msra.mxu0 %v326_v54  ;;  %v145_v54 = vld [vmem:[#allocation6 + $0x1f0] sm:$0xff] }
  0x42   :  { %328 = vmatprep.subr.bf16.mxu0 %v427_v0  ;;  %v161_v56 = vadd.f32 %v145_v54, %v128_v52 }
  0x44   :  { %v341_v58 = vpack.c.bf16 %v162_v57, %v161_v56 }
  0x49   :  { %330 = vmatpush3.bf16.xpose.msra.mxu0 %v329_v6 }
  0x4a   :  { %331 = vmatprep.subr.bf16.mxu0 %v427_v0 }
  0x51   :  { %333 = vmatpush3.bf16.xpose.msra.mxu0 %v332_v21 }
  0x52   :  { %334 = vmatprep.subr.bf16.mxu0 %v427_v0 }
  0x59   :  { %336 = vmatpush3.bf16.xpose.msra.mxu0 %v335_v36 }
  0x5a   :  { %337 = vmatprep.subr.bf16.mxu0 %v427_v0 }
  0x61   :  { %339 = vmatpush3.bf16.xpose.msra.mxu0 %v338_v51 }
  0x62   :  { %340 = vmatprep.subr.bf16.mxu0 %v427_v0 }
  0x69   :  { %342 = vmatpush3.bf16.xpose.msra.mxu0 %v341_v58 }
  0x70   :  { %317 = vmatmul.mubr.f32.vlgmr.msra.gmra.mrb[0].mxu0 %v164_v59 }
 0x143   :  { %v231_v60 = vpop.f32.mrb[0].mxu0 }
 0x144   :  { %v240_v62 = vmul.f32 0.25, %v231_v60  ;;  %v318_v63 = vpop.f32.mrb[1].mxu0 }
 0x146   :  { %v248_v1 = vadd.f32 %v266_v61, %v240_v62 }
 0x148   :  { %249 = vst [vmem:[#allocation8] sm:$0xff] %v248_v1 }
 0x149   :  { %406 = shalt.err (!%p403_p6)
}
 0x14a   :  { %s407_s16 = scalar_lea.hbm %s508_s3, 128 }
 0x14b   :  { %p408_p7 = scmp.ne.s32.totalorder %s508_s3, %s407_s16  ;;  %p411_p8 = scmp.lt.u32.totalorder %s407_s16, %s508_s3 }
 0x14d   :  { %p413_p9 = pnand %p411_p8, %p408_p7 }
 0x14f   :  { %416 = shalt.err (!%p413_p9)
}
 0x150   :  { %259 = dma.vmem_to_hbm [thread:$0]  %s257_s12, 128, %s508_s3, [#allocation5]  }
 0x151   :  { %421 = dma.done.wait [#allocation5], 128  }
 0x152   :  { %422 = vsyncadd [#allocation5], 4294967168 }
 0x153   :  { %263 = vsyncpa [#allocation4], 1 }
 0x154   :  { %264 = vsyncpa [#allocation7], 1 }
 0x155   :  { %265 = vsyncpa [#allocation5], 1 }

</bundles_post_ra>
